<compile_context>
chip_gen: v7x
topology: tpu7x:2x2x1
jax: 0.10.0
libtpu: 0.0.40
codegen_flags: <defaults>
</compile_context>

<pallas_src>
import functools

import jax
import jax.numpy as jnp
from jax.experimental import pallas as pl
from jax.experimental.pallas import tpu as pltpu


def _pick_tile(dim, want, align):
    """Largest tile <= want that divides dim and is `align`-aligned (or the full dim)."""
    if dim <= want:
        return dim
    t = (want // align) * align
    while t >= align:
        if dim % t == 0:
            return t
        t -= align
    return dim  # fall back to full dim (always legal)


# -----------------------------------------------------------------------------
# Tiled linear: out = x @ w (+ b), grid (M/tm, N/tn, K/tk), f32 VMEM accumulator
# -----------------------------------------------------------------------------
def _linear_kernel(*refs, has_bias, compute_dtype):
    if has_bias:
        x_ref, w_ref, b_ref, o_ref, acc_ref = refs
    else:
        x_ref, w_ref, o_ref, acc_ref = refs
        b_ref = None

    @pl.when(pl.program_id(2) == 0)
    def _():
        acc_ref[...] = jnp.zeros_like(acc_ref)

    acc_ref[...] += jnp.dot(
        x_ref[...].astype(compute_dtype),
        w_ref[...].astype(compute_dtype),
        preferred_element_type=jnp.float32)

    @pl.when(pl.program_id(2) == pl.num_programs(2) - 1)
    def _():
        y = acc_ref[...]
        if has_bias:
            # Epilogue-only bias add (once per output tile, lane-dense slab).
            y = y + b_ref[...].astype(jnp.float32)
        o_ref[...] = y.astype(o_ref.dtype)


def linear(x2d, w_t, b=None, *, tm=256, tn=256, tk=256,
           compute_dtype=jnp.bfloat16):
    M, K = x2d.shape
    K2, N = w_t.shape
    assert K == K2
    tm = _pick_tile(M, tm, 8)    # sublane dim of x / out blocks
    tk = _pick_tile(K, tk, 128)  # lane dim of x block, sublane dim of w block
    tn = _pick_tile(N, tn, 128)  # lane dim of w / out / bias blocks

    in_specs = [pl.BlockSpec((tm, tk), lambda i, j, k: (i, k)),
                pl.BlockSpec((tk, tn), lambda i, j, k: (k, j))]
    args = [x2d, w_t]
    if b is not None:
        in_specs.append(pl.BlockSpec((1, tn), lambda i, j, k: (0, j)))
        args.append(b)

    kernel = functools.partial(_linear_kernel, has_bias=b is not None,
                               compute_dtype=compute_dtype)
    return pl.pallas_call(
        kernel,
        out_shape=jax.ShapeDtypeStruct((M, N), x2d.dtype),
        grid_spec=pltpu.PrefetchScalarGridSpec(
            num_scalar_prefetch=0,
            grid=(M // tm, N // tn, K // tk),
            in_specs=in_specs,
            out_specs=pl.BlockSpec((tm, tn), lambda i, j, k: (i, j)),
            scratch_shapes=[pltpu.VMEM((tm, tn), jnp.float32)]),
        compiler_params=pltpu.CompilerParams(
            dimension_semantics=("parallel", "parallel", "arbitrary")),
    )(*args)


# -----------------------------------------------------------------------------
# Flash attention core: grid (B, q_tiles, kv_tiles), online softmax, heads batched
# -----------------------------------------------------------------------------
def _flash_attn_kernel(q_ref, k_ref, v_ref, o_ref, m_sc, l_sc, acc_sc,
                       *, scale, compute_dtype):
    kv = pl.program_id(2)

    @pl.when(kv == 0)
    def _():
        m_sc[...] = jnp.full_like(m_sc, -jnp.inf)
        l_sc[...] = jnp.zeros_like(l_sc)
        acc_sc[...] = jnp.zeros_like(acc_sc)

    # Scale on q: O(tq*hd) multiplies instead of O(tq*tk) on the scores.
    q = (q_ref[0].astype(jnp.float32) * scale).astype(compute_dtype)   # (H, tq, hd)
    k = k_ref[0].astype(compute_dtype)                                 # (H, tk, hd)
    v = v_ref[0].astype(compute_dtype)                                 # (H, tk, hd)

    # Batched over heads -> one MXU contraction per tile, no per-head slices.
    s = jnp.einsum('hqd,hkd->hqk', q, k,
                   preferred_element_type=jnp.float32)                 # (H, tq, tk) f32

    m_prev = m_sc[...]
    m_new = jnp.maximum(m_prev, jnp.max(s, axis=-1, keepdims=True))
    alpha = jnp.exp(m_prev - m_new)                                    # (H, tq, 1) f32
    p = jnp.exp(s - m_new)                                             # f32

    l_sc[...] = alpha * l_sc[...] + jnp.sum(p, axis=-1, keepdims=True)
    acc_sc[...] = alpha * acc_sc[...] + jnp.einsum(
        'hqk,hkd->hqd', p.astype(compute_dtype), v,
        preferred_element_type=jnp.float32)
    m_sc[...] = m_new

    @pl.when(kv == pl.num_programs(2) - 1)
    def _():
        inv_l = pl.reciprocal(l_sc[...], approx=True)                  # EUP, once per q tile
        o_ref[0] = (acc_sc[...] * inv_l).astype(o_ref.dtype)


def flash_attention(x, w_qkv_t, w_proj_t, b_proj, *, heads,
                    tq=128, tkv=128, compute_dtype=jnp.bfloat16):
    """Matches the PyTorch FlashAttention.forward (non-causal) semantics.

    x        : (B, N, D)
    w_qkv_t  : (D, 3D)  == qkv.weight.T   (no bias)
    w_proj_t : (D, D)   == proj.weight.T
    b_proj   : (1, D)
    """
    B, N, D = x.shape
    hd = D // heads
    scale = hd ** -0.5

    # 1) QKV projection (tiled Pallas matmul, no bias).
    qkv = linear(x.reshape(B * N, D), w_qkv_t, compute_dtype=compute_dtype)   # (B*N, 3D)
    # Split into per-head Q/K/V (plain XLA layout plumbing, outside the kernel).
    qkv = qkv.reshape(B, N, 3, heads, hd).transpose(2, 0, 3, 1, 4)            # (3, B, H, N, hd)
    q, k, v = qkv[0], qkv[1], qkv[2]                                          # (B, H, N, hd)

    tq = _pick_tile(N, tq, 8)
    tkv = _pick_tile(N, tkv, 8)

    attn = pl.pallas_call(
        functools.partial(_flash_attn_kernel, scale=scale,
                          compute_dtype=compute_dtype),
        out_shape=jax.ShapeDtypeStruct((B, heads, N, hd), x.dtype),
        grid_spec=pltpu.PrefetchScalarGridSpec(
            num_scalar_prefetch=0,
            grid=(B, N // tq, N // tkv),
            in_specs=[
                pl.BlockSpec((1, heads, tq, hd), lambda b, qi, ki: (b, 0, qi, 0)),
                pl.BlockSpec((1, heads, tkv, hd), lambda b, qi, ki: (b, 0, ki, 0)),
                pl.BlockSpec((1, heads, tkv, hd), lambda b, qi, ki: (b, 0, ki, 0)),
            ],
            out_specs=pl.BlockSpec((1, heads, tq, hd),
                                   lambda b, qi, ki: (b, 0, qi, 0)),
            scratch_shapes=[
                pltpu.VMEM((heads, tq, 1), jnp.float32),    # m (running max)
                pltpu.VMEM((heads, tq, 1), jnp.float32),    # l (running denom)
                pltpu.VMEM((heads, tq, hd), jnp.float32),   # acc (unnormalized out)
            ]),
        compiler_params=pltpu.CompilerParams(
            dimension_semantics=("parallel", "parallel", "arbitrary")),
    )(q, k, v)

    # Merge heads into a lane-dense (B, N, D) slab before the output projection.
    out = attn.transpose(0, 2, 1, 3).reshape(B, N, D)

    # 3) Output projection with bias (tiled Pallas matmul).
    y = linear(out.reshape(B * N, D), w_proj_t, b_proj, compute_dtype=compute_dtype)
    return y.reshape(B, N, D)


def flash_attention_ref(x, w_qkv_t, w_proj_t, b_proj, *, heads):
    """Pure-JAX f32 reference mirroring the PyTorch fallback path."""
    B, N, D = x.shape
    hd = D // heads
    scale = hd ** -0.5
    qkv = x @ w_qkv_t                                   # (B, N, 3D)
    qkv = qkv.reshape(B, N, 3, heads, hd).transpose(2, 0, 3, 1, 4)
    q, k, v = qkv[0], qkv[1], qkv[2]                    # (B, H, N, hd)
    s = jnp.einsum("bhqd,bhkd->bhqk", q, k) * scale
    a = jax.nn.softmax(s, axis=-1)
    o = jnp.einsum("bhqk,bhkd->bhqd", a, v)             # (B, H, N, hd)
    o = o.transpose(0, 2, 1, 3).reshape(B, N, D)
    return o @ w_proj_t + b_proj[0]


def _make_inputs(key, B, N, D):
    kx, kqkv, kproj, kbias = jax.random.split(key, 4)
    x = jax.random.normal(kx, (B, N, D), dtype=jnp.float32)
    bound = 1.0 / (D ** 0.5)  # PyTorch-like Linear init
    w_qkv = jax.random.uniform(kqkv, (3 * D, D), jnp.float32, -bound, bound)
    w_proj = jax.random.uniform(kproj, (D, D), jnp.float32, -bound, bound)
    b_proj = jax.random.uniform(kbias, (1, D), jnp.float32, -bound, bound)
    return x, w_qkv.T, w_proj.T, b_proj


if __name__ == "__main__":
    key = jax.random.PRNGKey(0)
    k1, k2 = jax.random.split(key)

    # Case 1: small shapes matching the module spec (B=2, N=16, D=32, H=4).
    B, N, D, H = 2, 16, 32, 4
    x, w_qkv_t, w_proj_t, b_proj = _make_inputs(k1, B, N, D)
    ref = flash_attention_ref(x, w_qkv_t, w_proj_t, b_proj, heads=H)

    out_f32 = jax.block_until_ready(
        flash_attention(x, w_qkv_t, w_proj_t, b_proj, heads=H,
                        compute_dtype=jnp.float32))
    assert out_f32.shape == (B, N, D)
    assert jnp.allclose(out_f32, ref, atol=5e-3, rtol=5e-3), "f32 mismatch vs reference"

    out_bf16 = jax.block_until_ready(
        flash_attention(x, w_qkv_t, w_proj_t, b_proj, heads=H,
                        compute_dtype=jnp.bfloat16))
    assert jnp.allclose(out_bf16, ref, atol=5e-2, rtol=5e-2), "bf16 mismatch vs reference"

    # Case 2: larger sequence so the flash grid actually tiles over q/kv blocks
    # (exercises the online-softmax accumulation across kv steps).
    B2, N2, D2, H2 = 2, 256, 128, 4
    x2, wq2, wp2, bp2 = _make_inputs(k2, B2, N2, D2)
    ref2 = flash_attention_ref(x2, wq2, wp2, bp2, heads=H2)
    out2 = jax.block_until_ready(
        flash_attention(x2, wq2, wp2, bp2, heads=H2, tq=128, tkv=128,
                        compute_dtype=jnp.bfloat16))
    assert out2.shape == (B2, N2, D2)
    assert jnp.allclose(out2, ref2, atol=5e-2, rtol=5e-2), "tiled bf16 mismatch vs reference"

    print("KERNEL_OK")
</pallas_src>

<mosaic_0001>
module attributes {stable_mosaic.version = 11 : i64} {
  func.func @_linear_kernel(%arg0: i32, %arg1: i32, %arg2: i32, %arg3: memref<32x32xf32, #tpu.memory_space<vmem>>, %arg4: memref<32x96xf32, #tpu.memory_space<vmem>>, %arg5: memref<32x96xf32, #tpu.memory_space<vmem>>, %arg6: memref<32x96xf32, #tpu.memory_space<vmem>>) attributes {dimension_semantics = [#tpu.dimension_semantics<parallel>, #tpu.dimension_semantics<parallel>, #tpu.dimension_semantics<arbitrary>], iteration_bounds = array<i64: 1, 1, 1>, scalar_prefetch = 0 : i64, scratch_operands = 1 : i64, tpu.core_type = #tpu.core_type<tc>, window_params = [{transform_indices = @transform_0, window_bounds = array<i64: 32, 32>}, {transform_indices = @transform_1, window_bounds = array<i64: 32, 96>}, {transform_indices = @transform_2, window_bounds = array<i64: 32, 96>}]} {
    %c0_i32 = arith.constant 0 : i32
    %0 = arith.cmpi eq, %arg2, %c0_i32 : i32
    %1 = arith.extui %0 : i1 to i32
    %c0_i32_0 = arith.constant 0 : i32
    %2 = arith.cmpi ne, %1, %c0_i32_0 : i32
    scf.if %2 {
      %cst_10 = arith.constant 0.000000e+00 : f32
      %12 = vector.broadcast %cst_10 : f32 to vector<32x96xf32>
      %c0_11 = arith.constant 0 : index
      %c0_12 = arith.constant 0 : index
      %13 = vector.load %arg6[%c0_11, %c0_12] : memref<32x96xf32, #tpu.memory_space<vmem>>, vector<32x96xf32>
      tpu.vector_store %arg6[%c0_11, %c0_12], %12 {strides = array<i32>} : memref<32x96xf32, #tpu.memory_space<vmem>>, vector<32x96xf32>,
    } else {
    }
    %c0 = arith.constant 0 : index
    %c0_1 = arith.constant 0 : index
    %3 = vector.load %arg6[%c0, %c0_1] : memref<32x96xf32, #tpu.memory_space<vmem>>, vector<32x96xf32>
    %c0_2 = arith.constant 0 : index
    %c0_3 = arith.constant 0 : index
    %4 = vector.load %arg3[%c0_2, %c0_3] : memref<32x32xf32, #tpu.memory_space<vmem>>, vector<32x32xf32>
    %c0_4 = arith.constant 0 : index
    %c0_5 = arith.constant 0 : index
    %5 = vector.load %arg4[%c0_4, %c0_5] : memref<32x96xf32, #tpu.memory_space<vmem>>, vector<32x96xf32>
    %cst = arith.constant dense<0.000000e+00> : vector<32x96xf32>
    %6 = tpu.matmul %4, %5, %cst {dimension_numbers = #tpu.dot_dimension_numbers<[1], [0], [0], [1], [0, 0, 1, 1], [], []>} : vector<32x32xf32>, vector<32x96xf32>, vector<32x96xf32> -> vector<32x96xf32>
    %7 = arith.addf %3, %6 : vector<32x96xf32>
    %c0_6 = arith.constant 0 : index
    %c0_7 = arith.constant 0 : index
    %8 = vector.load %arg6[%c0_6, %c0_7] : memref<32x96xf32, #tpu.memory_space<vmem>>, vector<32x96xf32>
    tpu.vector_store %arg6[%c0_6, %c0_7], %7 {strides = array<i32>} : memref<32x96xf32, #tpu.memory_space<vmem>>, vector<32x96xf32>,
    %c0_i32_8 = arith.constant 0 : i32
    %9 = arith.cmpi eq, %arg2, %c0_i32_8 : i32
    %10 = arith.extui %9 : i1 to i32
    %c0_i32_9 = arith.constant 0 : i32
    %11 = arith.cmpi ne, %10, %c0_i32_9 : i32
    scf.if %11 {
      %c0_10 = arith.constant 0 : index
      %c0_11 = arith.constant 0 : index
      %12 = vector.load %arg6[%c0_10, %c0_11] : memref<32x96xf32, #tpu.memory_space<vmem>>, vector<32x96xf32>
      %c0_12 = arith.constant 0 : index
      %c0_13 = arith.constant 0 : index
      %13 = vector.load %arg5[%c0_12, %c0_13] : memref<32x96xf32, #tpu.memory_space<vmem>>, vector<32x96xf32>
      tpu.vector_store %arg5[%c0_12, %c0_13], %12 {strides = array<i32>} : memref<32x96xf32, #tpu.memory_space<vmem>>, vector<32x96xf32>,
    } else {
    }
    return
  }
  func.func @transform_0(%arg0: i32, %arg1: i32, %arg2: i32) -> (i32, i32) {
    %c0_i32 = arith.constant 0 : i32
    return %arg0, %arg2 : i32, i32
  }
  func.func @transform_1(%arg0: i32, %arg1: i32, %arg2: i32) -> (i32, i32) {
    %c0_i32 = arith.constant 0 : i32
    return %arg2, %arg1 : i32, i32
  }
  func.func @transform_2(%arg0: i32, %arg1: i32, %arg2: i32) -> (i32, i32) {
    %c0_i32 = arith.constant 0 : i32
    return %arg0, %arg1 : i32, i32
  }
}

</mosaic_0001>

<bundles_post_ra>
// kernel: tpu_custom_call.1
= control target key start
LH: loop header
LB: loop body
LE: loop exit
PB: predicated region body
PF: predicated region fallthrough
CT: control target
= control target key end

     0   :  { %7 = vsyncpa [#allocation4], 0  ;;  %s395_s0 = inlined_call_operand.hbm [shape: f32[32,32], index: 0, kind: input, shape index: {}]   ;;  %s396_s1 = inlined_call_operand.hbm [shape: f32[32,96], index: 1, kind: input, shape index: {}]   ;;  %s397_s2 = inlined_call_operand.hbm [shape: f32[32,96], index: 2, kind: output, shape index: {}]  }
   0x1   :  { %8 = vsyncpa [#allocation7], 0 }
   0x2   :  { %9 = vsyncpa [#allocation5], 0  ;;  %s313_s9 = smov [#allocation3]   ;;  %s241_s13 = scalar_lea.hbm %s395_s0, 512 }
   0x3   :  { %s15_s10 = sshll.u32 %s313_s9, 4  ;;  %p242_p0 = scmp.ne.s32.totalorder %s395_s0, %s241_s13  ;;  %s16_s10 = int_to_ptr.vmem [resolvable:$true] %s15_s10 }
   0x4   :  { %p245_p1 = scmp.lt.u32.totalorder %s241_s13, %s395_s0 }
   0x6   :  { %p247_p2 = pnand %p245_p1, %p242_p0 }
   0x8   :  { %250 = shalt.err (!%p247_p2)
}
   0x9   :  { %s251_s18 = scalar_lea.vmem %s16_s10, 512  ;;  %p256_p4 = scmp.lt.s32.totalorder %s16_s10, %s16_s10 }
   0xa   :  { %p252_p3 = scmp.ne.s32.totalorder %s16_s10, %s251_s18  ;;  %p257_p5 = scmp.lt.s32.totalorder %s251_s18, %s251_s18 }
   0xc   :  { %p258_p6 = por %p257_p5, %p256_p4 }
   0xe   :  { %p259_p7 = pnand %p258_p6, %p252_p3 }
  0x10   :  { %262 = shalt.err (!%p259_p7)
}
  0x11   :  { %s314_s19 = smov 128   ;;  %s315_s20 = smov 8  }
  0x12   :  { %21 = dma.hbm_to_vmem [thread:$0]  %s395_s0, 512, %s16_s10, [#allocation4], %s314_s19, %s314_s19, %s315_s20  }
  0x13   :  { %s316_s23 = smov [#allocation6]   ;;  %s263_s27 = scalar_lea.hbm %s396_s1, 512 }
  0x14   :  { %s27_s24 = sshll.u32 %s316_s23, 4  ;;  %p264_p8 = scmp.ne.s32.totalorder %s396_s1, %s263_s27  ;;  %s28_s24 = int_to_ptr.vmem [resolvable:$true] %s27_s24 }
  0x15   :  { %p267_p9 = scmp.lt.u32.totalorder %s263_s27, %s396_s1 }
  0x17   :  { %p269_p10 = pnand %p267_p9, %p264_p8 }
  0x19   :  { %272 = shalt.err (!%p269_p10)
}
  0x1a   :  { %s273_s4 = scalar_lea.vmem %s28_s24, 512  ;;  %p278_p12 = scmp.lt.s32.totalorder %s28_s24, %s28_s24 }
  0x1b   :  { %p274_p11 = scmp.ne.s32.totalorder %s28_s24, %s273_s4  ;;  %p279_p13 = scmp.lt.s32.totalorder %s273_s4, %s273_s4 }
  0x1d   :  { %p280_p0 = por %p279_p13, %p278_p12 }
  0x1f   :  { %p281_p1 = pnand %p280_p0, %p274_p11 }
  0x21   :  { %284 = shalt.err (!%p281_p1)
}
  0x22   :  { %33 = dma.hbm_to_vmem [thread:$0]  %s396_s1, 512, %s28_s24, [#allocation7], %s314_s19, %s314_s19, %s315_s20  }
  0x23   :  { %307 = dma.done.wait [#allocation4], 512  }
  0x24   :  { %308 = vsyncadd [#allocation4], 4294966784 }
  0x25   :  { %309 = dma.done.wait [#allocation7], 512  }
  0x26   :  { %310 = vsyncadd [#allocation7], 4294966784  ;;  %vm44_vm0 = vcmask 785408   ;;  %v317_v0 = vmov 0.0   ;;  %vm61_vm1 = vcmask 261120   ;;  %v57_v1 = vld [vmem:[#allocation6] sm:$0xff] }
  0x27   :  { %46 = vst.msk [vmem:[#allocation2 + $0x8] sm:$0xff] %vm44_vm0, %v317_v0  ;;  %45 = vst.msk [vmem:[#allocation2] sm:$0xff] %vm44_vm0, %v317_v0  ;;  %v58_v2 = vld [vmem:[#allocation6 + $0x8] sm:$0xff]  ;;  %v59_v3 = vld [vmem:[#allocation6 + $0x10] sm:$0xff]  ;;  %s318_s1 = smov [#allocation8]  }
  0x28   :  { %47 = vst.msk [vmem:[#allocation2 + $0x10] sm:$0xff] %vm44_vm0, %v317_v0  ;;  %48 = vst.msk [vmem:[#allocation2 + $0x18] sm:$0xff] %vm44_vm0, %v317_v0  ;;  %v223_v4 = vpack.c.bf16 %v58_v2, %v57_v1  ;;  %v60_v5 = vld [vmem:[#allocation6 + $0x18] sm:$0xff]  ;;  %v53_v6 = vld [vmem:[#allocation3] sm:$0xff]  ;;  %s184_s6 = sshll.u32 %s318_s1, 4  ;;  %s185_s6 = int_to_ptr.vmem [resolvable:$true] %s184_s6 }
  0x29   :  { %v55_v7 = vld [vmem:[#allocation3 + $0x10] sm:$0xff]  ;;  %v227_v8 = vpack.c.bf16 %v60_v5, %v59_v3  ;;  %217 = vmatprep.mubr.msk.f32.mxu0 %vm61_vm1, %v53_v6  ;;  %v54_v9 = vld [vmem:[#allocation3 + $0x8] sm:$0xff]  ;;  %v56_v10 = vld [vmem:[#allocation3 + $0x18] sm:$0xff]  ;;  %s285_s7 = scalar_lea.vmem %s185_s6, 512  ;;  %p290_p3 = scmp.lt.s32.totalorder %s185_s6, %s185_s6 }
  0x2a   :  { %220 = vmatprep.mubr.msk.f32.mxu1 %vm61_vm1, %v55_v7  ;;  %224 = vmatprep.subr.bf16.mxu0 %v223_v4  ;;  %p286_p2 = scmp.ne.s32.totalorder %s185_s6, %s285_s7  ;;  %p291_p4 = scmp.lt.s32.totalorder %s285_s7, %s285_s7 }
  0x2b   :  { %231 = vmatprep.subr.bf16.mxu1 %v223_v4  ;;  %226 = vmatpush3.bf16.msra.mxu0 %v223_v4 }
  0x2c   :  { %233 = vmatpush3.bf16.msra.mxu1 %v223_v4  ;;  %228 = vmatprep.subr.bf16.mxu0 %v227_v8  ;;  %p292_p5 = por %p291_p4, %p290_p3 }
  0x2d   :  { %232 = vmatprep.subr.bf16.mxu1 %v227_v8 }
  0x2e   :  { %v50_v11 = vld [vmem:[#allocation2 + $0x8] sm:$0xff]  ;;  %v49_v13 = vld [vmem:[#allocation2] sm:$0xff]  ;;  %p293_p6 = pnand %p292_p5, %p286_p2 }
  0x2f   :  { %230 = vmatpush3.bf16.msra.mxu0 %v227_v8  ;;  %v52_v12 = vld [vmem:[#allocation2 + $0x18] sm:$0xff]  ;;  %v51_v14 = vld [vmem:[#allocation2 + $0x10] sm:$0xff] }
  0x30   :  { %234 = vmatpush3.bf16.msra.mxu1 %v227_v8 }
  0x32   :  { %218 = vmatmul.mubr.msk.f32.vlgmr.msra.gmra.mrb[0].mxu0 %vm61_vm1, %v54_v9 }
  0x33   :  { %221 = vmatmul.mubr.msk.f32.vlgmr.msra.gmra.mrb[0].mxu1 %vm61_vm1, %v56_v10 }
 0x105   :  { %v219_v15 = vpop.f32.mrb[0].mxu0 }
 0x106   :  { %v222_v16 = vpop.f32.mrb[0].mxu1  ;;  %v160_v17 = vadd.f32 %v219_v15, %v50_v11  ;;  %v140_v19 = vpop.f32.mrb[1].mxu0 }
 0x107   :  { %v162_v18 = vadd.f32 %v222_v16, %v52_v12  ;;  %v150_v20 = vpop.f32.mrb[1].mxu1  ;;  %v159_v21 = vadd.f32 %v140_v19, %v49_v13 }
 0x108   :  { %v161_v22 = vadd.f32 %v150_v20, %v51_v14  ;;  %165 = vst.msk [vmem:[#allocation2 + $0x8] sm:$0xff] %vm44_vm0, %v160_v17 }
 0x109   :  { %167 = vst.msk [vmem:[#allocation2 + $0x18] sm:$0xff] %vm44_vm0, %v162_v18  ;;  %164 = vst.msk [vmem:[#allocation2] sm:$0xff] %vm44_vm0, %v159_v21 }
 0x10a   :  { %166 = vst.msk [vmem:[#allocation2 + $0x10] sm:$0xff] %vm44_vm0, %v161_v22 }
 0x10f   :  { %v172_v23 = vld [vmem:[#allocation2 + $0x8] sm:$0xff] }
 0x110   :  { %v174_v24 = vld [vmem:[#allocation2 + $0x18] sm:$0xff]  ;;  %v171_v25 = vld [vmem:[#allocation2] sm:$0xff]  ;;  %176 = vst.msk [vmem:[#allocation8 + $0x8] sm:$0xff] %vm44_vm0, %v172_v23 }
 0x111   :  { %v173_v26 = vld [vmem:[#allocation2 + $0x10] sm:$0xff]  ;;  %178 = vst.msk [vmem:[#allocation8 + $0x18] sm:$0xff] %vm44_vm0, %v174_v24  ;;  %175 = vst.msk [vmem:[#allocation8] sm:$0xff] %vm44_vm0, %v171_v25 }
 0x112   :  { %177 = vst.msk [vmem:[#allocation8 + $0x10] sm:$0xff] %vm44_vm0, %v173_v26 }
 0x113   :  { %296 = shalt.err (!%p293_p6)
}
 0x114   :  { %s297_s10 = scalar_lea.hbm %s397_s2, 512 }
 0x115   :  { %p298_p7 = scmp.ne.s32.totalorder %s397_s2, %s297_s10  ;;  %p301_p8 = scmp.lt.u32.totalorder %s297_s10, %s397_s2 }
 0x117   :  { %p303_p9 = pnand %p301_p8, %p298_p7 }
 0x119   :  { %306 = shalt.err (!%p303_p9)
}
 0x11a   :  { %190 = dma.vmem_to_hbm [thread:$0]  %s185_s6, 512, %s397_s2, [#allocation5], %s314_s19, %s314_s19, %s315_s20  }
 0x11b   :  { %311 = dma.done.wait [#allocation5], 512  }
 0x11c   :  { %312 = vsyncadd [#allocation5], 4294966784 }
 0x11d   :  { %194 = vsyncpa [#allocation4], 1 }
 0x11e   :  { %195 = vsyncpa [#allocation7], 1 }
 0x11f   :  { %196 = vsyncpa [#allocation5], 1 }

</bundles_post_ra>
